<compile_context>
chip_gen: v5e
topology: v5e:2x2
jax: 0.10.0
libtpu: 0.0.40
codegen_flags: <defaults>
</compile_context>

<pallas_src>
import jax
import jax.numpy as jnp
from jax.experimental import pallas as pl
from jax.experimental.pallas import tpu as pltpu


_VMEM_LIMIT = 32 * 1024 * 1024  # safe on v5e / v6e / v7x


# ----------------------------------------------------------------------------
# Pallas kernels
# ----------------------------------------------------------------------------
def _upsample_kernel(x_ref, rh_ref, rwt_ref, o_ref):
    """Separable bilinear x2 for a tile of planes: o[p] = R_h @ x[p] @ R_w^T."""
    rh = rh_ref[...]           # (Ho, H)
    rwt = rwt_ref[...]         # (W, Wo)
    for p in range(x_ref.shape[0]):                                        # small static unroll
        t = jnp.dot(x_ref[p], rwt, preferred_element_type=jnp.float32)    # (H, Wo)
        o_ref[p] = jnp.dot(rh, t, preferred_element_type=jnp.float32)     # (Ho, Wo)


def _fused_attn_kernel(g_ref, xa_ref, xe_ref,
                       wga_ref, wxa_ref, ba_ref, wpa_ref,
                       wge_ref, wxe_ref, be_ref, wpe_ref,
                       bp_ref,
                       oa_ref, oe_ref):
    """Both CrossSpatialAttention branches on one [C, spatial-tile] slab.

    Layout: channels on sublanes, spatial on lanes (lane-dense loads/stores).
        h   = Wg @ g + Wx @ x + (bg + bx)        -- two MXU matmuls, BN folded
        psi = relu(h)
        a   = sum_f wp[f] * psi[f, :] + bp       -- VPU mul + sublane reduce (width-1 conv)
        out = x * sigmoid(a)
    """
    g = g_ref[...]                                          # (Cg, tn)

    def branch(x, wg_ref, wx_ref, b_ref, wp_ref, bp):
        h = (jnp.dot(wg_ref[...], g, preferred_element_type=jnp.float32)
             + jnp.dot(wx_ref[...], x, preferred_element_type=jnp.float32)
             + b_ref[...])                                              # (F, tn)
        psi = jnp.maximum(h, 0.0)
        a = jnp.sum(psi * wp_ref[...], axis=0, keepdims=True) + bp     # (1, tn)
        return x * jax.nn.sigmoid(a)

    oa_ref[...] = branch(xa_ref[...], wga_ref, wxa_ref, ba_ref, wpa_ref, bp_ref[0])
    oe_ref[...] = branch(xe_ref[...], wge_ref, wxe_ref, be_ref, wpe_ref, bp_ref[1])


# ----------------------------------------------------------------------------
# Wrappers
# ----------------------------------------------------------------------------
def _bilinear_matrix(out_size, in_size):
    """Row-interp matrix matching torch Upsample(scale_factor=2, bilinear, align_corners=True)."""
    o = jnp.arange(out_size, dtype=jnp.float32)
    src = o * (in_size - 1) / (out_size - 1)
    i0 = jnp.clip(jnp.floor(src).astype(jnp.int32), 0, in_size - 1)
    i1 = jnp.clip(i0 + 1, 0, in_size - 1)
    w1 = src - i0.astype(jnp.float32)
    w0 = 1.0 - w1
    rows = jnp.arange(out_size)
    m = jnp.zeros((out_size, in_size), jnp.float32)
    m = m.at[rows, i0].add(w0)
    m = m.at[rows, i1].add(w1)
    return m


def bilinear_upsample_x2(x_nchw, plane_tile=8):
    """NCHW bilinear x2 (align_corners=True) via separable per-plane matmuls."""
    b, c, h, w = x_nchw.shape
    ho, wo = 2 * h, 2 * w
    rh = _bilinear_matrix(ho, h)            # (Ho, H)
    rwt = _bilinear_matrix(wo, w).T         # (W, Wo)
    planes = x_nchw.reshape(b * c, h, w).astype(jnp.float32)
    p = b * c
    tp = min(plane_tile, p)
    out = pl.pallas_call(
        _upsample_kernel,
        out_shape=jax.ShapeDtypeStruct((p, ho, wo), jnp.float32),
        grid=(pl.cdiv(p, tp),),
        in_specs=[
            pl.BlockSpec((tp, h, w), lambda i: (i, 0, 0)),
            pl.BlockSpec((ho, h), lambda i: (0, 0)),
            pl.BlockSpec((w, wo), lambda i: (0, 0)),
        ],
        out_specs=pl.BlockSpec((tp, ho, wo), lambda i: (i, 0, 0)),
        compiler_params=pltpu.CompilerParams(
            dimension_semantics=("parallel",),
            vmem_limit_bytes=_VMEM_LIMIT),
    )(planes, rh, rwt)
    return out.reshape(b, c, ho, wo)


def fused_cross_attention(g, xa, xe, aux_params, enc_params, spatial_tile=512):
    """g:(B,Cg,S)  xa:(B,Ca,S)  xe:(B,Ce,S) -> (aux_att, enc_att) with shapes of xa / xe."""
    b, cg, s = g.shape
    ca, ce = xa.shape[1], xe.shape[1]
    wga, wxa, ba, wpa, bpa = aux_params
    wge, wxe, be, wpe, bpe = enc_params
    fa, fe = wga.shape[0], wge.shape[0]
    bp_both = jnp.concatenate([bpa.reshape(1), bpe.reshape(1)])   # (2,) -> SMEM scalars

    tn = min(spatial_tile, s)

    def data_spec(c):
        return pl.BlockSpec((None, c, tn), lambda bi, j: (bi, 0, j))

    def weight_spec(shape):
        return pl.BlockSpec(shape, lambda bi, j: (0, 0))

    oa, oe = pl.pallas_call(
        _fused_attn_kernel,
        out_shape=(jax.ShapeDtypeStruct((b, ca, s), jnp.float32),
                   jax.ShapeDtypeStruct((b, ce, s), jnp.float32)),
        grid=(b, pl.cdiv(s, tn)),
        in_specs=[
            data_spec(cg), data_spec(ca), data_spec(ce),
            weight_spec((fa, cg)), weight_spec((fa, ca)),
            weight_spec((fa, 1)), weight_spec((fa, 1)),
            weight_spec((fe, cg)), weight_spec((fe, ce)),
            weight_spec((fe, 1)), weight_spec((fe, 1)),
            pl.BlockSpec(memory_space=pltpu.MemorySpace.SMEM),
        ],
        out_specs=(data_spec(ca), data_spec(ce)),
        compiler_params=pltpu.CompilerParams(
            dimension_semantics=("parallel", "parallel"),
            vmem_limit_bytes=_VMEM_LIMIT),
    )(g, xa, xe, wga, wxa, ba, wpa, wge, wxe, be, wpe, bp_both)
    return oa, oe


def cross_attention_block_forward(main_feature, aux_feature, enc_feature,
                                  aux_params, enc_params):
    """main/aux: [B, Cm/Ca, H, W];  enc: [B, Ce, 2H, 2W]  ->  [B, Cm+Ca+Ce, 2H, 2W]."""
    b, cm, h, w = main_feature.shape
    ca = aux_feature.shape[1]
    ce = enc_feature.shape[1]
    ho, wo = 2 * h, 2 * w
    s = ho * wo

    # Batch main + aux through ONE upsample call (shared interpolation matrices).
    up = bilinear_upsample_x2(jnp.concatenate([main_feature, aux_feature], axis=1))
    main_up, aux_up = up[:, :cm], up[:, cm:]

    # NCHW flattened per batch is already the lane-dense [C, spatial] layout: no transposes.
    g = main_up.reshape(b, cm, s)
    xa = aux_up.reshape(b, ca, s)
    xe = enc_feature.astype(jnp.float32).reshape(b, ce, s)

    aux_att, enc_att = fused_cross_attention(g, xa, xe, aux_params, enc_params)

    out = jnp.concatenate([main_up,
                           aux_att.reshape(b, ca, ho, wo),
                           enc_att.reshape(b, ce, ho, wo)], axis=1)
    # TODO(synk): self.dec_conv = ChannelAttentionBlock(...) is undefined in the source
    #             module; returning the concatenated feature instead of (dec, dec_att).
    return out


# ----------------------------------------------------------------------------
# Deterministic parameter init (eval-mode BatchNorm folded into the 1x1 convs)
# ----------------------------------------------------------------------------
def _init_csa_params(key, f_g, f_l, f_int):
    """Returns (wg, wx, b, wp, bp) with BN folded:
       wg:(F_int,F_g)  wx:(F_int,F_l)  b:(F_int,1)=bg+bx  wp:(F_int,1)  bp:(1,)"""
    def conv_bn(k, cin, cout):
        kw, kb, kg, kbt, km, kv = jax.random.split(k, 6)
        wgt = 0.2 * jax.random.normal(kw, (cout, cin), jnp.float32)
        bias = 0.1 * jax.random.normal(kb, (cout,), jnp.float32)
        gamma = 1.0 + 0.1 * jax.random.normal(kg, (cout,), jnp.float32)
        beta = 0.1 * jax.random.normal(kbt, (cout,), jnp.float32)
        mean = 0.1 * jax.random.normal(km, (cout,), jnp.float32)
        var = 1.0 + 0.5 * jax.random.uniform(kv, (cout,), jnp.float32)
        scale = gamma / jnp.sqrt(var + 1e-5)
        return wgt * scale[:, None], (bias - mean) * scale + beta

    k1, k2, k3 = jax.random.split(key, 3)
    wg, bg = conv_bn(k1, f_g, f_int)      # (F_int, F_g), (F_int,)
    wx, bx = conv_bn(k2, f_l, f_int)      # (F_int, F_l), (F_int,)
    wp, bp = conv_bn(k3, f_int, 1)        # (1, F_int), (1,)
    return (wg, wx, (bg + bx)[:, None], wp.reshape(f_int, 1), bp)


# ----------------------------------------------------------------------------
# Pure-JAX reference (same math, no Pallas) for a correctness check
# ----------------------------------------------------------------------------
def _csa_ref(g, x, params):
    wg, wx, b, wp, bp = params
    h = (jnp.einsum('fc,bcs->bfs', wg, g)
         + jnp.einsum('fc,bcs->bfs', wx, x) + b[None])
    psi = jnp.maximum(h, 0.0)
    a = jnp.sum(psi * wp[None], axis=1, keepdims=True) + bp[0]
    return x * jax.nn.sigmoid(a)


def _upsample_ref(x):
    b, c, h, w = x.shape
    rh = _bilinear_matrix(2 * h, h)
    rw = _bilinear_matrix(2 * w, w)
    return jnp.einsum('uh,bchw,vw->bcuv', rh, x, rw)


def _ref_forward(main_feature, aux_feature, enc_feature, aux_params, enc_params):
    b, cm, h, w = main_feature.shape
    ca, ce = aux_feature.shape[1], enc_feature.shape[1]
    ho, wo = 2 * h, 2 * w
    s = ho * wo
    main_up = _upsample_ref(main_feature)
    aux_up = _upsample_ref(aux_feature)
    g = main_up.reshape(b, cm, s)
    aux_att = _csa_ref(g, aux_up.reshape(b, ca, s), aux_params)
    enc_att = _csa_ref(g, enc_feature.reshape(b, ce, s), enc_params)
    return jnp.concatenate([main_up,
                            aux_att.reshape(b, ca, ho, wo),
                            enc_att.reshape(b, ce, ho, wo)], axis=1)


# ----------------------------------------------------------------------------
if __name__ == "__main__":
    main_channels, aux_channels, enc_channels = 4, 4, 4
    B, H, W = 2, 8, 8  # main/aux at low res; enc at 2H x 2W

    key = jax.random.PRNGKey(0)
    k_main, k_aux, k_enc, k_pa, k_pe = jax.random.split(key, 5)
    main_feature = jax.random.normal(k_main, (B, main_channels, H, W), jnp.float32)
    aux_feature = jax.random.normal(k_aux, (B, aux_channels, H, W), jnp.float32)
    enc_feature = jax.random.normal(k_enc, (B, enc_channels, 2 * H, 2 * W), jnp.float32)

    aux_params = _init_csa_params(k_pa, main_channels, aux_channels, aux_channels // 2)
    enc_params = _init_csa_params(k_pe, main_channels, enc_channels, enc_channels // 2)

    out = cross_attention_block_forward(main_feature, aux_feature, enc_feature,
                                        aux_params, enc_params)
    out = jax.block_until_ready(out)

    ref = _ref_forward(main_feature, aux_feature, enc_feature, aux_params, enc_params)
    assert out.shape == (B, main_channels + aux_channels + enc_channels, 2 * H, 2 * W)
    assert jnp.allclose(out, ref, atol=1e-4, rtol=1e-4), "mismatch vs pure-JAX reference"

    print("KERNEL_OK")
</pallas_src>

<mosaic_0001>
module attributes {stable_mosaic.version = 11 : i64} {
  func.func @_upsample_kernel(%arg0: i32, %arg1: memref<8x8x8xf32, #tpu.memory_space<vmem>>, %arg2: memref<16x8xf32, #tpu.memory_space<vmem>>, %arg3: memref<8x16xf32, #tpu.memory_space<vmem>>, %arg4: memref<8x16x16xf32, #tpu.memory_space<vmem>>) attributes {dimension_semantics = [#tpu.dimension_semantics<parallel>], iteration_bounds = array<i64: 2>, scalar_prefetch = 0 : i64, scratch_operands = 0 : i64, tpu.core_type = #tpu.core_type<tc>, window_params = [{transform_indices = @transform_0, window_bounds = array<i64: 8, 8, 8>}, {pipeline_mode = #tpu.pipeline_mode<synchronous>, transform_indices = @transform_1, window_bounds = array<i64: 16, 8>}, {pipeline_mode = #tpu.pipeline_mode<synchronous>, transform_indices = @transform_2, window_bounds = array<i64: 8, 16>}, {transform_indices = @transform_3, window_bounds = array<i64: 8, 16, 16>}]} {
    %c0 = arith.constant 0 : index
    %c0_0 = arith.constant 0 : index
    %0 = vector.load %arg2[%c0, %c0_0] : memref<16x8xf32, #tpu.memory_space<vmem>>, vector<16x8xf32>
    %c0_1 = arith.constant 0 : index
    %c0_2 = arith.constant 0 : index
    %1 = vector.load %arg3[%c0_1, %c0_2] : memref<8x16xf32, #tpu.memory_space<vmem>>, vector<8x16xf32>
    %c0_3 = arith.constant 0 : index
    %c0_4 = arith.constant 0 : index
    %c0_5 = arith.constant 0 : index
    %2 = vector.load %arg1[%c0_3, %c0_4, %c0_5] : memref<8x8x8xf32, #tpu.memory_space<vmem>>, vector<1x8x8xf32>
    %3 = vector.shape_cast %2 : vector<1x8x8xf32> to vector<8x8xf32>
    %cst = arith.constant dense<0.000000e+00> : vector<8x16xf32>
    %4 = tpu.matmul %3, %1, %cst {dimension_numbers = #tpu.dot_dimension_numbers<[1], [0], [0], [1], [0, 0, 1, 1], [], []>} : vector<8x8xf32>, vector<8x16xf32>, vector<8x16xf32> -> vector<8x16xf32>
    %cst_6 = arith.constant dense<0.000000e+00> : vector<16x16xf32>
    %5 = tpu.matmul %0, %4, %cst_6 {dimension_numbers = #tpu.dot_dimension_numbers<[1], [0], [0], [1], [0, 0, 1, 1], [], []>} : vector<16x8xf32>, vector<8x16xf32>, vector<16x16xf32> -> vector<16x16xf32>
    %c0_7 = arith.constant 0 : index
    %c0_8 = arith.constant 0 : index
    %c0_9 = arith.constant 0 : index
    %6 = vector.load %arg4[%c0_7, %c0_8, %c0_9] : memref<8x16x16xf32, #tpu.memory_space<vmem>>, vector<1x16x16xf32>
    %7 = vector.shape_cast %6 : vector<1x16x16xf32> to vector<16x16xf32>
    %8 = vector.shape_cast %5 : vector<16x16xf32> to vector<1x16x16xf32>
    tpu.vector_store %arg4[%c0_7, %c0_8, %c0_9], %8 {strides = array<i32>} : memref<8x16x16xf32, #tpu.memory_space<vmem>>, vector<1x16x16xf32>,
    %c1 = arith.constant 1 : index
    %c0_10 = arith.constant 0 : index
    %c0_11 = arith.constant 0 : index
    %9 = vector.load %arg1[%c1, %c0_10, %c0_11] : memref<8x8x8xf32, #tpu.memory_space<vmem>>, vector<1x8x8xf32>
    %10 = vector.shape_cast %9 : vector<1x8x8xf32> to vector<8x8xf32>
    %cst_12 = arith.constant dense<0.000000e+00> : vector<8x16xf32>
    %11 = tpu.matmul %10, %1, %cst_12 {dimension_numbers = #tpu.dot_dimension_numbers<[1], [0], [0], [1], [0, 0, 1, 1], [], []>} : vector<8x8xf32>, vector<8x16xf32>, vector<8x16xf32> -> vector<8x16xf32>
    %cst_13 = arith.constant dense<0.000000e+00> : vector<16x16xf32>
    %12 = tpu.matmul %0, %11, %cst_13 {dimension_numbers = #tpu.dot_dimension_numbers<[1], [0], [0], [1], [0, 0, 1, 1], [], []>} : vector<16x8xf32>, vector<8x16xf32>, vector<16x16xf32> -> vector<16x16xf32>
    %c1_14 = arith.constant 1 : index
    %c0_15 = arith.constant 0 : index
    %c0_16 = arith.constant 0 : index
    %13 = vector.load %arg4[%c1_14, %c0_15, %c0_16] : memref<8x16x16xf32, #tpu.memory_space<vmem>>, vector<1x16x16xf32>
    %14 = vector.shape_cast %13 : vector<1x16x16xf32> to vector<16x16xf32>
    %15 = vector.shape_cast %12 : vector<16x16xf32> to vector<1x16x16xf32>
    tpu.vector_store %arg4[%c1_14, %c0_15, %c0_16], %15 {strides = array<i32>} : memref<8x16x16xf32, #tpu.memory_space<vmem>>, vector<1x16x16xf32>,
    %c2 = arith.constant 2 : index
    %c0_17 = arith.constant 0 : index
    %c0_18 = arith.constant 0 : index
    %16 = vector.load %arg1[%c2, %c0_17, %c0_18] : memref<8x8x8xf32, #tpu.memory_space<vmem>>, vector<1x8x8xf32>
    %17 = vector.shape_cast %16 : vector<1x8x8xf32> to vector<8x8xf32>
    %cst_19 = arith.constant dense<0.000000e+00> : vector<8x16xf32>
    %18 = tpu.matmul %17, %1, %cst_19 {dimension_numbers = #tpu.dot_dimension_numbers<[1], [0], [0], [1], [0, 0, 1, 1], [], []>} : vector<8x8xf32>, vector<8x16xf32>, vector<8x16xf32> -> vector<8x16xf32>
    %cst_20 = arith.constant dense<0.000000e+00> : vector<16x16xf32>
    %19 = tpu.matmul %0, %18, %cst_20 {dimension_numbers = #tpu.dot_dimension_numbers<[1], [0], [0], [1], [0, 0, 1, 1], [], []>} : vector<16x8xf32>, vector<8x16xf32>, vector<16x16xf32> -> vector<16x16xf32>
    %c2_21 = arith.constant 2 : index
    %c0_22 = arith.constant 0 : index
    %c0_23 = arith.constant 0 : index
    %20 = vector.load %arg4[%c2_21, %c0_22, %c0_23] : memref<8x16x16xf32, #tpu.memory_space<vmem>>, vector<1x16x16xf32>
    %21 = vector.shape_cast %20 : vector<1x16x16xf32> to vector<16x16xf32>
    %22 = vector.shape_cast %19 : vector<16x16xf32> to vector<1x16x16xf32>
    tpu.vector_store %arg4[%c2_21, %c0_22, %c0_23], %22 {strides = array<i32>} : memref<8x16x16xf32, #tpu.memory_space<vmem>>, vector<1x16x16xf32>,
    %c3 = arith.constant 3 : index
    %c0_24 = arith.constant 0 : index
    %c0_25 = arith.constant 0 : index
    %23 = vector.load %arg1[%c3, %c0_24, %c0_25] : memref<8x8x8xf32, #tpu.memory_space<vmem>>, vector<1x8x8xf32>
    %24 = vector.shape_cast %23 : vector<1x8x8xf32> to vector<8x8xf32>
    %cst_26 = arith.constant dense<0.000000e+00> : vector<8x16xf32>
    %25 = tpu.matmul %24, %1, %cst_26 {dimension_numbers = #tpu.dot_dimension_numbers<[1], [0], [0], [1], [0, 0, 1, 1], [], []>} : vector<8x8xf32>, vector<8x16xf32>, vector<8x16xf32> -> vector<8x16xf32>
    %cst_27 = arith.constant dense<0.000000e+00> : vector<16x16xf32>
    %26 = tpu.matmul %0, %25, %cst_27 {dimension_numbers = #tpu.dot_dimension_numbers<[1], [0], [0], [1], [0, 0, 1, 1], [], []>} : vector<16x8xf32>, vector<8x16xf32>, vector<16x16xf32> -> vector<16x16xf32>
    %c3_28 = arith.constant 3 : index
    %c0_29 = arith.constant 0 : index
    %c0_30 = arith.constant 0 : index
    %27 = vector.load %arg4[%c3_28, %c0_29, %c0_30] : memref<8x16x16xf32, #tpu.memory_space<vmem>>, vector<1x16x16xf32>
    %28 = vector.shape_cast %27 : vector<1x16x16xf32> to vector<16x16xf32>
    %29 = vector.shape_cast %26 : vector<16x16xf32> to vector<1x16x16xf32>
    tpu.vector_store %arg4[%c3_28, %c0_29, %c0_30], %29 {strides = array<i32>} : memref<8x16x16xf32, #tpu.memory_space<vmem>>, vector<1x16x16xf32>,
    %c4 = arith.constant 4 : index
    %c0_31 = arith.constant 0 : index
    %c0_32 = arith.constant 0 : index
    %30 = vector.load %arg1[%c4, %c0_31, %c0_32] : memref<8x8x8xf32, #tpu.memory_space<vmem>>, vector<1x8x8xf32>
    %31 = vector.shape_cast %30 : vector<1x8x8xf32> to vector<8x8xf32>
    %cst_33 = arith.constant dense<0.000000e+00> : vector<8x16xf32>
    %32 = tpu.matmul %31, %1, %cst_33 {dimension_numbers = #tpu.dot_dimension_numbers<[1], [0], [0], [1], [0, 0, 1, 1], [], []>} : vector<8x8xf32>, vector<8x16xf32>, vector<8x16xf32> -> vector<8x16xf32>
    %cst_34 = arith.constant dense<0.000000e+00> : vector<16x16xf32>
    %33 = tpu.matmul %0, %32, %cst_34 {dimension_numbers = #tpu.dot_dimension_numbers<[1], [0], [0], [1], [0, 0, 1, 1], [], []>} : vector<16x8xf32>, vector<8x16xf32>, vector<16x16xf32> -> vector<16x16xf32>
    %c4_35 = arith.constant 4 : index
    %c0_36 = arith.constant 0 : index
    %c0_37 = arith.constant 0 : index
    %34 = vector.load %arg4[%c4_35, %c0_36, %c0_37] : memref<8x16x16xf32, #tpu.memory_space<vmem>>, vector<1x16x16xf32>
    %35 = vector.shape_cast %34 : vector<1x16x16xf32> to vector<16x16xf32>
    %36 = vector.shape_cast %33 : vector<16x16xf32> to vector<1x16x16xf32>
    tpu.vector_store %arg4[%c4_35, %c0_36, %c0_37], %36 {strides = array<i32>} : memref<8x16x16xf32, #tpu.memory_space<vmem>>, vector<1x16x16xf32>,
    %c5 = arith.constant 5 : index
    %c0_38 = arith.constant 0 : index
    %c0_39 = arith.constant 0 : index
    %37 = vector.load %arg1[%c5, %c0_38, %c0_39] : memref<8x8x8xf32, #tpu.memory_space<vmem>>, vector<1x8x8xf32>
    %38 = vector.shape_cast %37 : vector<1x8x8xf32> to vector<8x8xf32>
    %cst_40 = arith.constant dense<0.000000e+00> : vector<8x16xf32>
    %39 = tpu.matmul %38, %1, %cst_40 {dimension_numbers = #tpu.dot_dimension_numbers<[1], [0], [0], [1], [0, 0, 1, 1], [], []>} : vector<8x8xf32>, vector<8x16xf32>, vector<8x16xf32> -> vector<8x16xf32>
    %cst_41 = arith.constant dense<0.000000e+00> : vector<16x16xf32>
    %40 = tpu.matmul %0, %39, %cst_41 {dimension_numbers = #tpu.dot_dimension_numbers<[1], [0], [0], [1], [0, 0, 1, 1], [], []>} : vector<16x8xf32>, vector<8x16xf32>, vector<16x16xf32> -> vector<16x16xf32>
    %c5_42 = arith.constant 5 : index
    %c0_43 = arith.constant 0 : index
    %c0_44 = arith.constant 0 : index
    %41 = vector.load %arg4[%c5_42, %c0_43, %c0_44] : memref<8x16x16xf32, #tpu.memory_space<vmem>>, vector<1x16x16xf32>
    %42 = vector.shape_cast %41 : vector<1x16x16xf32> to vector<16x16xf32>
    %43 = vector.shape_cast %40 : vector<16x16xf32> to vector<1x16x16xf32>
    tpu.vector_store %arg4[%c5_42, %c0_43, %c0_44], %43 {strides = array<i32>} : memref<8x16x16xf32, #tpu.memory_space<vmem>>, vector<1x16x16xf32>,
    %c6 = arith.constant 6 : index
    %c0_45 = arith.constant 0 : index
    %c0_46 = arith.constant 0 : index
    %44 = vector.load %arg1[%c6, %c0_45, %c0_46] : memref<8x8x8xf32, #tpu.memory_space<vmem>>, vector<1x8x8xf32>
    %45 = vector.shape_cast %44 : vector<1x8x8xf32> to vector<8x8xf32>
    %cst_47 = arith.constant dense<0.000000e+00> : vector<8x16xf32>
    %46 = tpu.matmul %45, %1, %cst_47 {dimension_numbers = #tpu.dot_dimension_numbers<[1], [0], [0], [1], [0, 0, 1, 1], [], []>} : vector<8x8xf32>, vector<8x16xf32>, vector<8x16xf32> -> vector<8x16xf32>
    %cst_48 = arith.constant dense<0.000000e+00> : vector<16x16xf32>
    %47 = tpu.matmul %0, %46, %cst_48 {dimension_numbers = #tpu.dot_dimension_numbers<[1], [0], [0], [1], [0, 0, 1, 1], [], []>} : vector<16x8xf32>, vector<8x16xf32>, vector<16x16xf32> -> vector<16x16xf32>
    %c6_49 = arith.constant 6 : index
    %c0_50 = arith.constant 0 : index
    %c0_51 = arith.constant 0 : index
    %48 = vector.load %arg4[%c6_49, %c0_50, %c0_51] : memref<8x16x16xf32, #tpu.memory_space<vmem>>, vector<1x16x16xf32>
    %49 = vector.shape_cast %48 : vector<1x16x16xf32> to vector<16x16xf32>
    %50 = vector.shape_cast %47 : vector<16x16xf32> to vector<1x16x16xf32>
    tpu.vector_store %arg4[%c6_49, %c0_50, %c0_51], %50 {strides = array<i32>} : memref<8x16x16xf32, #tpu.memory_space<vmem>>, vector<1x16x16xf32>,
    %c7 = arith.constant 7 : index
    %c0_52 = arith.constant 0 : index
    %c0_53 = arith.constant 0 : index
    %51 = vector.load %arg1[%c7, %c0_52, %c0_53] : memref<8x8x8xf32, #tpu.memory_space<vmem>>, vector<1x8x8xf32>
    %52 = vector.shape_cast %51 : vector<1x8x8xf32> to vector<8x8xf32>
    %cst_54 = arith.constant dense<0.000000e+00> : vector<8x16xf32>
    %53 = tpu.matmul %52, %1, %cst_54 {dimension_numbers = #tpu.dot_dimension_numbers<[1], [0], [0], [1], [0, 0, 1, 1], [], []>} : vector<8x8xf32>, vector<8x16xf32>, vector<8x16xf32> -> vector<8x16xf32>
    %cst_55 = arith.constant dense<0.000000e+00> : vector<16x16xf32>
    %54 = tpu.matmul %0, %53, %cst_55 {dimension_numbers = #tpu.dot_dimension_numbers<[1], [0], [0], [1], [0, 0, 1, 1], [], []>} : vector<16x8xf32>, vector<8x16xf32>, vector<16x16xf32> -> vector<16x16xf32>
    %c7_56 = arith.constant 7 : index
    %c0_57 = arith.constant 0 : index
    %c0_58 = arith.constant 0 : index
    %55 = vector.load %arg4[%c7_56, %c0_57, %c0_58] : memref<8x16x16xf32, #tpu.memory_space<vmem>>, vector<1x16x16xf32>
    %56 = vector.shape_cast %55 : vector<1x16x16xf32> to vector<16x16xf32>
    %57 = vector.shape_cast %54 : vector<16x16xf32> to vector<1x16x16xf32>
    tpu.vector_store %arg4[%c7_56, %c0_57, %c0_58], %57 {strides = array<i32>} : memref<8x16x16xf32, #tpu.memory_space<vmem>>, vector<1x16x16xf32>,
    return
  }
  func.func @transform_0(%arg0: i32) -> (i32, i32, i32) {
    %c0_i32 = arith.constant 0 : i32
    %c0_i32_0 = arith.constant 0 : i32
    %c0_i32_1 = arith.constant 0 : i32
    return %arg0, %c0_i32, %c0_i32_0 : i32, i32, i32
  }
  func.func @transform_1(%arg0: i32) -> (i32, i32) {
    %c0_i32 = arith.constant 0 : i32
    %c0_i32_0 = arith.constant 0 : i32
    %c0_i32_1 = arith.constant 0 : i32
    return %c0_i32, %c0_i32_0 : i32, i32
  }
  func.func @transform_2(%arg0: i32) -> (i32, i32) {
    %c0_i32 = arith.constant 0 : i32
    %c0_i32_0 = arith.constant 0 : i32
    %c0_i32_1 = arith.constant 0 : i32
    return %c0_i32, %c0_i32_0 : i32, i32
  }
  func.func @transform_3(%arg0: i32) -> (i32, i32, i32) {
    %c0_i32 = arith.constant 0 : i32
    %c0_i32_0 = arith.constant 0 : i32
    %c0_i32_1 = arith.constant 0 : i32
    return %arg0, %c0_i32, %c0_i32_0 : i32, i32, i32
  }
}

</mosaic_0001>

<bundles_post_ra>
// kernel: tpu_custom_call.1
= control target key start
LH: loop header
LB: loop body
LE: loop exit
PB: predicated region body
PF: predicated region fallthrough
CT: control target
= control target key end

     0   :  { %8 = vsyncpa [#allocation3], 0  ;;  %s1042_s0 = inlined_call_operand.vmem [shape: f32[16,8,8], index: 0, kind: input, shape index: {}]   ;;  %s1043_s1 = inlined_call_operand.vmem [shape: f32[16,8], index: 1, kind: input, shape index: {}]   ;;  %s1044_s2 = inlined_call_operand.vmem [shape: f32[8,16], index: 2, kind: input, shape index: {}]   ;;  %s1045_s3 = inlined_call_operand.hbm [shape: f32[16,16,16], index: 3, kind: output, shape index: {}]  }
   0x1   :  { %10 = vsyncpa [#allocation3 + $0x1], 0  ;;  %s856_s12 = smov 0   ;;  %s858_s13 = smov 0  }
   0x2   :  { %s860_s14 = smov 0   ;;  %s862_s15 = smov 0  }
   0x3 LB: > { %s877_s16 = sadd.s32 4294967295, %s832_s15   ;;  %s668_s17 = sadd.s32 4294967294, %s832_s15   ;;  %s832_s15 = sphi %s862_s15, %s1051_s15   ;;  %s828_s14 = sphi %s860_s14, %s1050_s14   ;;  %s824_s13 = sphi %s858_s13, %s1049_s13   ;;  %s820_s12 = sphi %s856_s12, %s1048_s12  }
   0x4   : > { %s881_s18 = sadd.s32 1, %s832_s15   ;;  %s91_s19 = sadd.s32 1, %s828_s14 }
   0x5   : > { %s88_s20 = ssub.s32 %s832_s15, %s881_s18  ;;  %p101_p0 = scmp.ne.s32.totalorder %s828_s14, %s824_s13 }
   0x6   : > { %p89_p1 = scmp.eq.s32.totalorder %s88_s20, 0  ;;  %p102_p2 = scmp.eq.s32.totalorder %s877_s16, 1 }
   0x7   : > { %p107_p3 = scmp.ne.s32.totalorder %s824_s13, %s820_s12  ;;  %p108_p4 = scmp.eq.s32.totalorder %s668_s17, 1 }
   0x8   : > { %s892_s21 = scalar_select %p89_p1, %s828_s14, %s91_s19  }
   0x9   : > { %p894_p5 = por %p102_p2, %p101_p0  ;;  %p898_p6 = por %p108_p4, %p107_p3 }
   0xa   : > { %p671_p7 = scmp.ge.s32.totalorder %s832_s15, 1  ;;  %p141_p8 = scmp.lt.s32.totalorder %s832_s15, 3 }
   0xc   : > { %p142_p9 = pnand %p671_p7, %p141_p8 }
   0xd   : > { %s673_s26 = sshll.u32 (!%p142_p9), %s877_s16, 3  ;;  %s162_s8 = sand.u32 (!%p142_p9), 1, %s824_s13  }
   0xe   : > { %145 = sbr.rel (%p142_p9) target bundleno = 588 (0x24c), region = 32  ;;  %p166_p10 = scmp.lt.s32.totalorder (!%p142_p9), %s673_s26, 15 }
   0xf   : > { %s672_s9 = sshll.u32 (!%p142_p9), %s162_s8, 7  ;;  %s727_s11 = sshll.u32 (!%p142_p9), %s877_s16, 7 }
  0x10   : > { %s954_s10 = scalar_lea.vmem (!%p142_p9), [#allocation2], %s672_s9  ;;  %s602_s20 = scalar_lea.hbm (!%p142_p9), %s1045_s3, %s727_s11 }
  0x11   : > { %s603_s24 = sshll.u32 (!%p142_p9), %s954_s10, 4  ;;  %s605_s25 = sshll.u32 (!%p142_p9), %s602_s20, 4  ;;  %s604_s24 = int_to_ptr.vmem [resolvable:$true] %s603_s24  ;;  %s606_s25 = int_to_ptr.hbm [resolvable:$true] %s605_s25 }
  0x13   : > { %v174_v0 = vld [vmem:[%s1044_s2] sm:$0xff]  ;;  %s1053_s26 = smov (!%p166_p10, %s673_s26), 15  ;;  %vm176_vm0 = vcmask 64512   ;;  %v924_v5 = vld [vmem:[%s1043_s1 + $0x8] sm:$0xff]  ;;  %vm229_vm1 = vcmask 130048  }
  0x14   : > { %195 = vmatpush.msra.mxu0 %v174_v0  ;;  %252 = vmatpush.msra.mxu2 %v174_v0  ;;  %s674_s27 = sshll.u32 %s1053_s26, 3  ;;  %v929_v7 = vld [vmem:[%s1043_s1] sm:$0xff]  ;;  %s590_s26 = scalar_lea.sflag [#allocation3], %s162_s8 }
  0x15   : > { %s911_s30 = scalar_lea.vmem %s1042_s0, %s674_s27  ;;  %s784_s27 = sshra.s32 %s606_s25, 4  ;;  %s785_s27 = int_to_ptr.hbm [resolvable:$true] %s784_s27 }
  0x16   : > { %303 = vmatpush.msrb.mxu0 %v174_v0  ;;  %v175_v1 = vld [vmem:[%s911_s30] sm:$0xff]  ;;  %v678_v2 = vld [vmem:[%s911_s30 + $0x8] sm:$0xff]  ;;  %v684_v3 = vld [vmem:[%s911_s30 + $0x10] sm:$0xff]  ;;  %s786_s28 = scalar_lea.hbm %s785_s27, 128  ;;  %p791_p0 = scmp.lt.s32.totalorder %s785_s27, %s1045_s3 }
  0x17   : > { %675 = vmatmul.msk.f32.vlgmr.msra.gmra.mxu0 %vm176_vm0, %v175_v1  ;;  %679 = vmatmul.msk.f32.vlgmr.msra.gmra.mxu2 %vm176_vm0, %v678_v2  ;;  %v690_v4 = vld [vmem:[%s911_s30 + $0x18] sm:$0xff]  ;;  %v696_v9 = vld [vmem:[%s911_s30 + $0x20] sm:$0xff]  ;;  %v702_v12 = vld [vmem:[%s911_s30 + $0x28] sm:$0xff]  ;;  %p787_p11 = scmp.ne.s32.totalorder %s785_s27, %s786_s28 }
  0x18   : > { %354 = vmatpush.msra.mxu0 %v174_v0  ;;  %v708_v14 = vld [vmem:[%s911_s30 + $0x30] sm:$0xff]  ;;  %v714_v19 = vld [vmem:[%s911_s30 + $0x38] sm:$0xff]  ;;  %s790_s30 = scalar_lea.hbm %s1045_s3, 256 }
  0x19   : > { %p788_p12 = pnand %p787_p11, %p894_p5  ;;  %p792_p1 = scmp.lt.s32.totalorder %s790_s30, %s786_s28 }
  0x1b   : > { %p789_p13 = pneg %p788_p12  ;;  %p793_p2 = por %p792_p1, %p791_p0 }
  0x1d   : > { %p794_p3 = pnand %p793_p2, %p789_p13 }
  0x1f   : > { %685 = vmatmul.msk.f32.vlgmr.msrb.gmra.mxu0 %vm176_vm0, %v684_v3 }
  0x27   : > { %691 = vmatmul.msk.f32.vlgmr.msra.gmra.mxu0 %vm176_vm0, %v690_v4 }
  0x94   : > { %v197_v6 = vpop.f32.mrf.mxu0 }
  0x95   : > { %221 = vmatpush.msra.mxu1 %v197_v6  ;;  %728 = vmatpush.msra.mxu3 %v197_v6 }
  0x96   : > { %677 = vmatmul.msk.f32.vlgmr.msra.gmra.mxu3 %vm176_vm0, %v924_v5  ;;  %676 = vmatmul.msk.f32.vlgmr.msra.gmra.mxu1 %vm176_vm0, %v929_v7 }
  0x9a   : > { %v254_v8 = vpop.f32.mrf.mxu2 }
  0x9b   : > { %272 = vmatpush.msrb.mxu3 %v254_v8 }
  0x9c   : > { %v305_v10 = vpop.f32.mrf.mxu0 }
  0x9d   : > { %405 = vmatpush.msra.mxu3 %v174_v0  ;;  %323 = vmatpush.msrb.mxu2 %v305_v10 }
  0x9e   : > { %680 = vmatmul.msk.f32.vlgmr.msrb.gmra.mxu3 %vm176_vm0, %v929_v7  ;;  %686 = vmatmul.msk.f32.vlgmr.msrb.gmra.mxu2 %vm176_vm0, %v929_v7 }
  0x9f   : > { %456 = vmatpush.msra.mxu2 %v174_v0 }
  0xa4   : > { %v356_v11 = vpop.f32.mrf.mxu0 }
  0xa5   : > { %374 = vmatpush.msrb.mxu1 %v356_v11 }
  0xa6   : > { %681 = vmatmul.msk.f32.gmra.mxu3 %vm176_vm0, %v924_v5  ;;  %692 = vmatmul.msk.f32.vlgmr.msrb.gmra.mxu1 %vm176_vm0, %v929_v7 }
  0xa7   : > { %687 = vmatmul.msk.f32.gmra.mxu2 %vm176_vm0, %v924_v5  ;;  %507 = vmatpush.msra.mxu1 %v174_v0 }
  0xae   : > { %697 = vmatmul.msk.f32.vlgmr.msra.gmra.mxu3 %vm176_vm0, %v696_v9  ;;  %693 = vmatmul.msk.f32.gmra.mxu1 %vm176_vm0, %v924_v5 }
  0xaf   : > { %703 = vmatmul.msk.f32.vlgmr.msra.gmra.mxu2 %vm176_vm0, %v702_v12 }
  0xb6   : > { %709 = vmatmul.msk.f32.vlgmr.msra.gmra.mxu1 %vm176_vm0, %v708_v14 }
 0x113   : > { %v223_v16 = vpop.f32.mrf.mxu1 }
 0x114   : > { %230 = vst.msk [vmem:[%s954_s10] sm:$0xff] %vm229_vm1, %v223_v16 }
 0x119   : > { %v226_v13 = vpop.f32.mrf.mxu3 }
 0x11a   : > { %231 = vst.msk [vmem:[%s954_s10 + $0x8] sm:$0xff] %vm229_vm1, %v226_v13 }
 0x121   : > { %v274_v15 = vpop.f32.mrf.mxu3  ;;  %v325_v20 = vpop.f32.mrf.mxu2 }
 0x122   : > { %682 = vst.msk [vmem:[%s954_s10 + $0x10] sm:$0xff] %vm229_vm1, %v274_v15 }
 0x123   : > { %688 = vst.msk [vmem:[%s954_s10 + $0x20] sm:$0xff] %vm229_vm1, %v325_v20  ;;  %v376_v21 = vpop.f32.mrf.mxu1 }
 0x124   : > { %694 = vst.msk [vmem:[%s954_s10 + $0x30] sm:$0xff] %vm229_vm1, %v376_v21 }
 0x129   : > { %v277_v17 = vpop.f32.mrf.mxu3 }
 0x12a   : > { %683 = vst.msk [vmem:[%s954_s10 + $0x18] sm:$0xff] %vm229_vm1, %v277_v17  ;;  %v328_v22 = vpop.f32.mrf.mxu2 }
 0x12b   : > { %689 = vst.msk [vmem:[%s954_s10 + $0x28] sm:$0xff] %vm229_vm1, %v328_v22  ;;  %v379_v23 = vpop.f32.mrf.mxu1 }
 0x12c   : > { %695 = vst.msk [vmem:[%s954_s10 + $0x38] sm:$0xff] %vm229_vm1, %v379_v23 }
 0x131   : > { %v407_v18 = vpop.f32.mrf.mxu3 }
 0x132   : > { %425 = vmatpush.msrb.mxu0 %v407_v18  ;;  %v458_v24 = vpop.f32.mrf.mxu2 }
 0x133   : > { %698 = vmatmul.msk.f32.vlgmr.msrb.gmra.mxu0 %vm176_vm0, %v929_v7  ;;  %v509_v25 = vpop.f32.mrf.mxu1  ;;  %476 = vmatpush.msrb.mxu3 %v458_v24 }
 0x134   : > { %558 = vmatpush.msra.mxu0 %v174_v0  ;;  %527 = vmatpush.msrb.mxu2 %v509_v25 }
 0x135   : > { %704 = vmatmul.msk.f32.vlgmr.msrb.gmra.mxu3 %vm176_vm0, %v929_v7  ;;  %710 = vmatmul.msk.f32.vlgmr.msrb.gmra.mxu2 %vm176_vm0, %v929_v7 }
 0x13b   : > { %699 = vmatmul.msk.f32.gmra.mxu0 %vm176_vm0, %v924_v5 }
 0x13d   : > { %705 = vmatmul.msk.f32.gmra.mxu3 %vm176_vm0, %v924_v5  ;;  %711 = vmatmul.msk.f32.gmra.mxu2 %vm176_vm0, %v924_v5 }
 0x143   : > { %715 = vmatmul.msk.f32.vlgmr.msra.gmra.mxu0 %vm176_vm0, %v714_v19 }
 0x1b0   : > { %v427_v26 = vpop.f32.mrf.mxu0 }
 0x1b1   : > { %700 = vst.msk [vmem:[%s954_s10 + $0x40] sm:$0xff] %vm229_vm1, %v427_v26 }
 0x1b8   : > { %v430_v27 = vpop.f32.mrf.mxu0  ;;  %v478_v29 = vpop.f32.mrf.mxu3 }
 0x1b9   : > { %701 = vst.msk [vmem:[%s954_s10 + $0x48] sm:$0xff] %vm229_vm1, %v430_v27  ;;  %v529_v30 = vpop.f32.mrf.mxu2 }
 0x1ba   : > { %706 = vst.msk [vmem:[%s954_s10 + $0x50] sm:$0xff] %vm229_vm1, %v478_v29 }
 0x1bb   : > { %712 = vst.msk [vmem:[%s954_s10 + $0x60] sm:$0xff] %vm229_vm1, %v529_v30 }
 0x1c0   : > { %v560_v28 = vpop.f32.mrf.mxu0  ;;  %v481_v31 = vpop.f32.mrf.mxu3 }
 0x1c1   : > { %578 = vmatpush.msrb.mxu1 %v560_v28  ;;  %707 = vst.msk [vmem:[%s954_s10 + $0x58] sm:$0xff] %vm229_vm1, %v481_v31  ;;  %v532_v32 = vpop.f32.mrf.mxu2 }
 0x1c2   : > { %716 = vmatmul.msk.f32.vlgmr.msrb.gmra.mxu1 %vm176_vm0, %v929_v7  ;;  %713 = vst.msk [vmem:[%s954_s10 + $0x68] sm:$0xff] %vm229_vm1, %v532_v32 }
 0x1ca   : > { %717 = vmatmul.msk.f32.gmra.mxu1 %vm176_vm0, %v924_v5 }
 0x23f   : > { %v580_v33 = vpop.f32.mrf.mxu1 }
 0x240   : > { %718 = vst.msk [vmem:[%s954_s10 + $0x70] sm:$0xff] %vm229_vm1, %v580_v33 }
 0x247   : > { %v583_v34 = vpop.f32.mrf.mxu1 }
 0x248   : > { %719 = vst.msk [vmem:[%s954_s10 + $0x78] sm:$0xff] %vm229_vm1, %v583_v34 }
 0x249   : > { %797 = shalt.err (!%p794_p3)
}
 0x24a   : > { %s834_s6 = smov 128   ;;  %s835_s7 = smov 8  }
 0x24b   : > { %729 = dma.vmem_to_hbm [thread:$0]  (%p894_p5), %s604_s24, 2048, %s606_s25, %s590_s26, %s834_s6, %s834_s6, %s835_s7  }
 0x24c PF: > { %p735_p4 = scmp.ge.s32.totalorder %s832_s15, 2  ;;  %s620_s8 = sand.u32 1, %s820_s12  }
 0x24d   : > { %s621_s9 = scalar_lea.sflag [#allocation3], %s620_s8 }
 0x24e   : > { %p732_p7 = pnand %p735_p4, %p898_p6 }
 0x250   : > { %p733_p8 = pneg %p732_p7 }
 0x252   : > { %815 = dma.done.wait (%p733_p8), %s621_s9, 2048  }
 0x253   : > { %817 = vsyncadd (%p733_p8), %s621_s9, 4294965248  ;;  %p13_p9 = scmp.ge.s32.totalorder %s881_s18, 4   ;;  %s1048_s12 = smov %s824_s13 }
 0x254   : > { %s1049_s13 = smov %s828_s14  ;;  %s1050_s14 = smov %s892_s21 }
 0x255   : > { %s1051_s15 = smov %s881_s18  ;;  %15 = sbr.rel (!%p13_p9) target bundleno = 3 (0x3), region = 81 }
 0x25a   :  { %627 = vsyncpa [#allocation3], 1 }
 0x25b   :  { %629 = vsyncpa [#allocation3 + $0x1], 1 }

</bundles_post_ra>
